<compile_context>
chip_gen: v5e
topology: v5e:2x2
jax: 0.10.0
libtpu: 0.0.40
codegen_flags: <defaults>
</compile_context>

<pallas_src>
import jax
import jax.numpy as jnp
import numpy as np
from jax.experimental import pallas as pl
from jax.experimental.pallas import tpu as pltpu


# ----------------------------- Pallas kernel ------------------------------- #

def _fused_extractor_kernel(p_ref, w_ref, b_ref, a_ref, o_ref):
    """conv1_1 (im2col matmul) + bias + ReLU + fused resize/pad/avg-agg.

    p_ref: (1, K, H*W)   im2col patches (K = 9*Cin zero-padded to 32) —
                         K on sublanes, pixels on the 128-lane minor dim.
    w_ref: (Cout, K)     conv weights, channel-major.
    b_ref: (Cout, 1)     conv bias.
    a_ref: (H*W, Q)      aggregation matrix folding nearest-resize,
                         replication-pad and the kxk avg unfold; Q = oh*ow.
    o_ref: (1, Cout, Q)  channel-major (NCHW-ordered) pooled features.
    """
    conv = jnp.dot(w_ref[...], p_ref[0],
                   preferred_element_type=jnp.float32)          # (Cout, H*W)
    conv = jnp.maximum(conv + b_ref[...], 0.0)                  # bias + ReLU
    o_ref[0] = jnp.dot(conv, a_ref[...],
                       preferred_element_type=jnp.float32)      # (Cout, Q)


# ------------------------------- wrappers ----------------------------------- #

def _im2col_3x3(x_nchw, k_pad):
    """(N, Cin, H, W) -> (N, k_pad, H*W) with k = (dy*3+dx)*Cin + c.

    Zero padding = conv1_1's padding=1 (torch 'zeros' mode); extra K rows
    (27..k_pad-1) are zero and matched by zero weight columns.
    """
    N, Cin, H, W = x_nchw.shape
    xp = jnp.pad(x_nchw, ((0, 0), (0, 0), (1, 1), (1, 1)))
    taps = [xp[:, :, dy:dy + H, dx:dx + W]
            for dy in range(3) for dx in range(3)]               # 9 x (N,Cin,H,W)
    patches = jnp.stack(taps, axis=1).reshape(N, 9 * Cin, H * W)
    return jnp.pad(patches, ((0, 0), (0, k_pad - 9 * Cin), (0, 0)))


def fused_extract(patches, w2, b2, agg_mat):
    """patches: (N,K,HW), w2: (Cout,K), b2: (Cout,1), agg: (HW,Q) -> (N,Cout,Q)."""
    N, K, HW = patches.shape
    Cout = w2.shape[0]
    Q = agg_mat.shape[1]
    return pl.pallas_call(
        _fused_extractor_kernel,
        out_shape=jax.ShapeDtypeStruct((N, Cout, Q), jnp.float32),
        grid=(N,),
        in_specs=[
            pl.BlockSpec((1, K, HW), lambda n: (n, 0, 0)),
            pl.BlockSpec((Cout, K), lambda n: (0, 0)),
            pl.BlockSpec((Cout, 1), lambda n: (0, 0)),
            pl.BlockSpec((HW, Q), lambda n: (0, 0)),
        ],
        out_specs=pl.BlockSpec((1, Cout, Q), lambda n: (n, 0, 0)),
        compiler_params=pltpu.CompilerParams(
            dimension_semantics=("parallel",)),
    )(patches, w2, b2, agg_mat)


def _build_agg_matrix(conv_hw, map_size, kernel_size, stride, dilation,
                      padding, out_size):
    """(H*W, oh*ow) matrix = nearest-resize o replication-pad o kxk avg unfold."""
    H, W = conv_hw
    mh, mw = map_size
    kh, kw = kernel_size
    sh, sw = stride
    ph, pw = padding
    oh, ow = out_size
    inv = 1.0 / float(kh * kw)
    # torch F.interpolate(mode='nearest'): src = floor(dst * in / out)
    src_y = (np.arange(mh) * H) // mh
    src_x = (np.arange(mw) * W) // mw
    A = np.zeros((H * W, oh * ow), np.float32)
    for py in range(oh):
        for px in range(ow):
            q = py * ow + px
            for i in range(kh):
                my = min(max(py * sh + i * dilation - ph, 0), mh - 1)
                sy = int(src_y[my])
                for j in range(kw):
                    mx = min(max(px * sw + j * dilation - pw, 0), mw - 1)
                    sx = int(src_x[mx])
                    A[sy * W + sx, q] += inv
    return jnp.asarray(A)


# ------------------------------ Extractor ----------------------------------- #

class PallasExtractor:
    def __init__(self, key, *, cnn_layers=("relu1_1",), upsample="nearest",
                 is_agg=True, kernel_size=(4, 4), stride=(4, 4), dilation=1,
                 featmap_size=(16, 16)):
        assert upsample == "nearest"        # TODO(synk): bilinear not implemented
        assert is_agg                       # TODO(synk): is_agg=False branch not implemented
        assert cnn_layers == ("relu1_1",)   # TODO(synk): deeper VGG19 layers not needed here

        self.map_size = featmap_size
        self.patch_size = kernel_size
        self.stride = stride
        self.dilation = dilation
        pad_h = (kernel_size[0] - stride[0]) // 2
        pad_w = (kernel_size[1] - stride[1]) // 2
        self.padding = (pad_h, pad_w)
        self.out_h = int((featmap_size[0] + 2 * pad_h -
                          (dilation * (kernel_size[0] - 1) + 1)) / stride[0] + 1)
        self.out_w = int((featmap_size[1] + 2 * pad_w -
                          (dilation * (kernel_size[1] - 1) + 1)) / stride[1] + 1)
        self.out_size = (self.out_h, self.out_w)

        # VGG19 conv1_1 parameters (placeholder init), stored HWIO for the
        # reference conv and channel-major (Cout, K=32) for the kernel.
        self.cin, self.cout, self.k_pad = 3, 64, 32
        k1, k2 = jax.random.split(key)
        self.w_hwio = (0.05 * jax.random.normal(
            k1, (3, 3, self.cin, self.cout))).astype(jnp.float32)
        self.b = (0.05 * jax.random.normal(k2, (self.cout,))).astype(jnp.float32)
        w2 = self.w_hwio.reshape(9 * self.cin, self.cout).T          # (Cout, 27)
        self.w2 = jnp.pad(w2, ((0, 0), (0, self.k_pad - 9 * self.cin)))
        self.b2 = self.b.reshape(self.cout, 1)

        self._agg_cache = {}

    def _agg_matrix(self, H, W):
        key = (H, W)
        if key not in self._agg_cache:
            self._agg_cache[key] = _build_agg_matrix(
                (H, W), self.map_size, self.patch_size, self.stride,
                self.dilation, self.padding, self.out_size)
        return self._agg_cache[key]

    def __call__(self, x_nchw):
        x = x_nchw.astype(jnp.float32)
        N, Cin, H, W = x.shape
        assert Cin == self.cin
        patches = _im2col_3x3(x, self.k_pad)                  # (N, 32, H*W)
        agg = self._agg_matrix(H, W)                          # (H*W, oh*ow)
        out = fused_extract(patches, self.w2, self.b2, agg)   # (N, Cout, oh*ow)
        return out.reshape(N, self.cout, self.out_h, self.out_w)


# ------------------------------ reference ----------------------------------- #

def _reference(x_nchw, extr):
    """Pure-JAX reference: conv+ReLU -> nearest resize -> edge pad -> 4x4 mean."""
    x = jnp.transpose(x_nchw.astype(jnp.float32), (0, 2, 3, 1))
    y = jax.lax.conv_general_dilated(
        x, extr.w_hwio, window_strides=(1, 1), padding="SAME",
        dimension_numbers=("NHWC", "HWIO", "NHWC")) + extr.b
    y = jnp.maximum(y, 0.0)
    N, H, W, C = y.shape
    mh, mw = extr.map_size
    ridx = (jnp.arange(mh) * H) // mh
    cidx = (jnp.arange(mw) * W) // mw
    y = y[:, ridx][:, :, cidx]
    ph, pw = extr.padding
    y = jnp.pad(y, ((0, 0), (ph, ph), (pw, pw), (0, 0)), mode="edge")
    kh, kw = extr.patch_size
    oh, ow = extr.out_size
    # valid for the tested config (kernel == stride, zero-width pad)
    y = y.reshape(N, oh, kh, ow, kw, C).mean(axis=(2, 4))
    return jnp.transpose(y, (0, 3, 1, 2))


if __name__ == "__main__":
    key = jax.random.PRNGKey(0)
    k_param, k_data = jax.random.split(key)

    extractor = PallasExtractor(k_param, featmap_size=(16, 16),
                                kernel_size=(4, 4), stride=(4, 4))

    x = jax.random.normal(k_data, (2, 3, 16, 16), dtype=jnp.float32)  # NCHW

    out = jax.block_until_ready(extractor(x))
    ref = jax.block_until_ready(_reference(x, extractor))

    assert out.shape == (2, 64, extractor.out_h, extractor.out_w), out.shape
    np.testing.assert_allclose(np.asarray(out), np.asarray(ref),
                               rtol=1e-4, atol=1e-4)
    print("KERNEL_OK")
</pallas_src>

<mosaic_0001>
module attributes {stable_mosaic.version = 11 : i64} {
  func.func @_fused_extractor_kernel(%arg0: i32, %arg1: memref<1x32x256xf32, #tpu.memory_space<vmem>>, %arg2: memref<64x32xf32, #tpu.memory_space<vmem>>, %arg3: memref<64x1xf32, #tpu.memory_space<vmem>>, %arg4: memref<256x16xf32, #tpu.memory_space<vmem>>, %arg5: memref<1x64x16xf32, #tpu.memory_space<vmem>>) attributes {dimension_semantics = [#tpu.dimension_semantics<parallel>], iteration_bounds = array<i64: 2>, scalar_prefetch = 0 : i64, scratch_operands = 0 : i64, tpu.core_type = #tpu.core_type<tc>, window_params = [{transform_indices = @transform_0, window_bounds = array<i64: 1, 32, 256>}, {pipeline_mode = #tpu.pipeline_mode<synchronous>, transform_indices = @transform_1, window_bounds = array<i64: 64, 32>}, {pipeline_mode = #tpu.pipeline_mode<synchronous>, transform_indices = @transform_2, window_bounds = array<i64: 64, 1>}, {pipeline_mode = #tpu.pipeline_mode<synchronous>, transform_indices = @transform_3, window_bounds = array<i64: 256, 16>}, {transform_indices = @transform_4, window_bounds = array<i64: 1, 64, 16>}]} {
    %c0 = arith.constant 0 : index
    %c0_0 = arith.constant 0 : index
    %0 = vector.load %arg2[%c0, %c0_0] : memref<64x32xf32, #tpu.memory_space<vmem>>, vector<64x32xf32>
    %c0_1 = arith.constant 0 : index
    %c0_2 = arith.constant 0 : index
    %c0_3 = arith.constant 0 : index
    %1 = vector.load %arg1[%c0_1, %c0_2, %c0_3] : memref<1x32x256xf32, #tpu.memory_space<vmem>>, vector<1x32x256xf32>
    %2 = vector.shape_cast %1 : vector<1x32x256xf32> to vector<32x256xf32>
    %cst = arith.constant dense<0.000000e+00> : vector<64x256xf32>
    %3 = tpu.matmul %0, %2, %cst {dimension_numbers = #tpu.dot_dimension_numbers<[1], [0], [0], [1], [0, 0, 1, 1], [], []>} : vector<64x32xf32>, vector<32x256xf32>, vector<64x256xf32> -> vector<64x256xf32>
    %c0_4 = arith.constant 0 : index
    %c0_5 = arith.constant 0 : index
    %4 = vector.load %arg3[%c0_4, %c0_5] : memref<64x1xf32, #tpu.memory_space<vmem>>, vector<64x1xf32>
    %5 = vector.broadcast %4 : vector<64x1xf32> to vector<64x256xf32>
    %6 = arith.addf %3, %5 : vector<64x256xf32>
    %cst_6 = arith.constant 0.000000e+00 : f32
    %7 = vector.broadcast %cst_6 : f32 to vector<64x256xf32>
    %8 = arith.maximumf %6, %7 : vector<64x256xf32>
    %c0_7 = arith.constant 0 : index
    %c0_8 = arith.constant 0 : index
    %9 = vector.load %arg4[%c0_7, %c0_8] : memref<256x16xf32, #tpu.memory_space<vmem>>, vector<256x16xf32>
    %cst_9 = arith.constant dense<0.000000e+00> : vector<64x16xf32>
    %10 = tpu.matmul %8, %9, %cst_9 {dimension_numbers = #tpu.dot_dimension_numbers<[1], [0], [0], [1], [0, 0, 1, 1], [], []>} : vector<64x256xf32>, vector<256x16xf32>, vector<64x16xf32> -> vector<64x16xf32>
    %c0_10 = arith.constant 0 : index
    %c0_11 = arith.constant 0 : index
    %c0_12 = arith.constant 0 : index
    %11 = vector.load %arg5[%c0_10, %c0_11, %c0_12] : memref<1x64x16xf32, #tpu.memory_space<vmem>>, vector<1x64x16xf32>
    %12 = vector.shape_cast %11 : vector<1x64x16xf32> to vector<64x16xf32>
    %13 = vector.shape_cast %10 : vector<64x16xf32> to vector<1x64x16xf32>
    tpu.vector_store %arg5[%c0_10, %c0_11, %c0_12], %13 {strides = array<i32>} : memref<1x64x16xf32, #tpu.memory_space<vmem>>, vector<1x64x16xf32>,
    return
  }
  func.func @transform_0(%arg0: i32) -> (i32, i32, i32) {
    %c0_i32 = arith.constant 0 : i32
    %c0_i32_0 = arith.constant 0 : i32
    %c0_i32_1 = arith.constant 0 : i32
    return %arg0, %c0_i32, %c0_i32_0 : i32, i32, i32
  }
  func.func @transform_1(%arg0: i32) -> (i32, i32) {
    %c0_i32 = arith.constant 0 : i32
    %c0_i32_0 = arith.constant 0 : i32
    %c0_i32_1 = arith.constant 0 : i32
    return %c0_i32, %c0_i32_0 : i32, i32
  }
  func.func @transform_2(%arg0: i32) -> (i32, i32) {
    %c0_i32 = arith.constant 0 : i32
    %c0_i32_0 = arith.constant 0 : i32
    %c0_i32_1 = arith.constant 0 : i32
    return %c0_i32, %c0_i32_0 : i32, i32
  }
  func.func @transform_3(%arg0: i32) -> (i32, i32) {
    %c0_i32 = arith.constant 0 : i32
    %c0_i32_0 = arith.constant 0 : i32
    %c0_i32_1 = arith.constant 0 : i32
    return %c0_i32, %c0_i32_0 : i32, i32
  }
  func.func @transform_4(%arg0: i32) -> (i32, i32, i32) {
    %c0_i32 = arith.constant 0 : i32
    %c0_i32_0 = arith.constant 0 : i32
    %c0_i32_1 = arith.constant 0 : i32
    return %arg0, %c0_i32, %c0_i32_0 : i32, i32, i32
  }
}

</mosaic_0001>

<bundles_post_ra>
// kernel: tpu_custom_call.1
= control target key start
LH: loop header
LB: loop body
LE: loop exit
PB: predicated region body
PF: predicated region fallthrough
CT: control target
= control target key end

     0   :  { %s670_s15 = smov 0   ;;  %s872_s0 = inlined_call_operand.vmem [shape: f32[2,32,256], index: 0, kind: input, shape index: {}]   ;;  %s873_s1 = inlined_call_operand.vmem [shape: f32[64,32], index: 1, kind: input, shape index: {}]   ;;  %s874_s2 = inlined_call_operand.vmem [shape: f32[64,1], index: 2, kind: input, shape index: {}]   ;;  %s875_s3 = inlined_call_operand.vmem [shape: f32[256,16], index: 3, kind: input, shape index: {}]   ;;  %s876_s4 = inlined_call_operand.vmem [shape: f32[2,64,16], index: 4, kind: output, shape index: {}]  }
   0x1 LB: > { %s563_s16 = sadd.s32 4294967295, %s642_s15   ;;  %p567_p0 = scmp.ge.s32.totalorder %s642_s15, 1  ;;  %s642_s15 = sphi %s670_s15, %s14_s15  }
   0x2   : > { %p162_p1 = scmp.lt.s32.totalorder %s642_s15, 3 }
   0x4   : > { %p163_p2 = pnand %p567_p0, %p162_p1 }
   0x5   : > { %p188_p3 = scmp.lt.s32.totalorder (!%p163_p2), %s563_s16, 1 }
   0x6   : > { %166 = sbr.rel (%p163_p2) target bundleno = 344 (0x158), region = 36 }
   0xb   : > { %v217_v0 = vld [vmem:[%s874_s2 + $0x18] sm:$0xff]  ;;  %v644_v1 = vmov 0   ;;  %v215_v2 = vld [vmem:[%s874_s2 + $0x8] sm:$0xff]  ;;  %s878_s16 = smov (!%p188_p3, %s563_s16), 1  ;;  %v218_v7 = vld [vmem:[%s874_s2 + $0x20] sm:$0xff]  ;;  %vm262_vm0 = vcmask 261120  }
   0xc   : > { %634 = vset.pattern.permute.xlu1 %v644_v1  ;;  %633 = vset.pattern.permute.xlu0 %v644_v1  ;;  %s590_s21 = sshll.u32 %s878_s16, 6  ;;  %v216_v8 = vld [vmem:[%s874_s2 + $0x10] sm:$0xff]  ;;  %v198_v13 = vld [vmem:[%s873_s1] sm:$0xff]  ;;  %v221_v15 = vld [vmem:[%s874_s2 + $0x38] sm:$0xff]  ;;  %vm499_vm1 = vcmask 130048  }
   0xd   : > { %239 = vperm.xlu1 %634, %v217_v0   ;;  %229 = vperm.xlu0 %633, %v215_v2   ;;  %s192_s24 = scalar_lea.vmem %s872_s0, %s590_s21  ;;  %v214_v14 = vld [vmem:[%s874_s2] sm:$0xff]  ;;  %v199_v16 = vld [vmem:[%s873_s1 + $0x8] sm:$0xff]  ;;  %v200_v17 = vld [vmem:[%s873_s1 + $0x10] sm:$0xff]  ;;  %s851_s27 = scalar_lea.vmem %s876_s4, %s590_s21 }
   0xe   : > { %635 = vset.pattern.permute.xlu2 %v644_v1  ;;  %v212_v3 = vld [vmem:[%s192_s24 + $0x30] sm:$0xff]  ;;  %v213_v4 = vld [vmem:[%s192_s24 + $0x38] sm:$0xff]  ;;  %v210_v5 = vld [vmem:[%s192_s24 + $0x20] sm:$0xff] }
   0xf   : > { %299 = vmatpush.msra.mxu0 %v212_v3  ;;  %340 = vmatpush.msra.mxu1 %v213_v4  ;;  %v211_v6 = vld [vmem:[%s192_s24 + $0x28] sm:$0xff]  ;;  %v208_v9 = vld [vmem:[%s192_s24 + $0x10] sm:$0xff]  ;;  %v209_v10 = vld [vmem:[%s192_s24 + $0x18] sm:$0xff] }
  0x10   : > { %v206_v11 = vld [vmem:[%s192_s24] sm:$0xff]  ;;  %v207_v12 = vld [vmem:[%s192_s24 + $0x8] sm:$0xff]  ;;  %v201_v18 = vld [vmem:[%s873_s1 + $0x18] sm:$0xff] }
  0x11   : > { %300 = vmatpush.msra.mxu0 %v210_v5  ;;  %341 = vmatpush.msra.mxu1 %v211_v6  ;;  %v219_v19 = vld [vmem:[%s874_s2 + $0x28] sm:$0xff]  ;;  %v400_v20 = vld [vmem:[%s875_s3 + $0x78] sm:$0xff]  ;;  %v399_v22 = vld [vmem:[%s875_s3 + $0x70] sm:$0xff] }
  0x12   : > { %249 = vperm.xlu2 %635, %v219_v19   ;;  %v416_v21 = vld [vmem:[%s875_s3 + $0xf8] sm:$0xff]  ;;  %v415_v23 = vld [vmem:[%s875_s3 + $0xf0] sm:$0xff]  ;;  %v398_v24 = vld [vmem:[%s875_s3 + $0x68] sm:$0xff]  ;;  %592 = vmatpush.msra.mxu2 %v400_v20 }
  0x13   : > { %301 = vmatpush.msra.mxu0 %v208_v9  ;;  %342 = vmatpush.msra.mxu1 %v209_v10  ;;  %v414_v25 = vld [vmem:[%s875_s3 + $0xe8] sm:$0xff]  ;;  %v397_v26 = vld [vmem:[%s875_s3 + $0x60] sm:$0xff]  ;;  %v220_v28 = vld [vmem:[%s874_s2 + $0x30] sm:$0xff] }
  0x14   : > { %608 = vmatpush.msra.mxu3 %v416_v21  ;;  %593 = vmatpush.msra.mxu2 %v399_v22  ;;  %v202_v27 = vld [vmem:[%s873_s1 + $0x20] sm:$0xff]  ;;  %v396_v30 = vld [vmem:[%s875_s3 + $0x58] sm:$0xff]  ;;  %v203_v32 = vld [vmem:[%s873_s1 + $0x28] sm:$0xff] }
  0x15   : > { %244 = vperm.xlu1 %634, %v218_v7   ;;  %234 = vperm.xlu0 %633, %v216_v8   ;;  %v413_v29 = vld [vmem:[%s875_s3 + $0xe0] sm:$0xff]  ;;  %v412_v31 = vld [vmem:[%s875_s3 + $0xd8] sm:$0xff]  ;;  %v204_v33 = vld [vmem:[%s873_s1 + $0x30] sm:$0xff] }
  0x16   : > { %302 = vmatpush.msra.mxu0 %v206_v11  ;;  %343 = vmatpush.msra.mxu1 %v207_v12  ;;  %v205_v34 = vld [vmem:[%s873_s1 + $0x38] sm:$0xff]  ;;  %v395_v35 = vld [vmem:[%s875_s3 + $0x50] sm:$0xff]  ;;  %v394_v37 = vld [vmem:[%s875_s3 + $0x48] sm:$0xff] }
  0x17   : > { %572 = vmatmul.msk.f32.vlgmr.msra.gmra.mxu0 %vm262_vm0, %v198_v13  ;;  %580 = vmatmul.msk.f32.vlgmr.msra.gmra.mxu1 %vm262_vm0, %v198_v13  ;;  %v411_v36 = vld [vmem:[%s875_s3 + $0xd0] sm:$0xff]  ;;  %v410_v38 = vld [vmem:[%s875_s3 + $0xc8] sm:$0xff]  ;;  %v393_v39 = vld [vmem:[%s875_s3 + $0x40] sm:$0xff] }
  0x18   : > { %417 = vmatpush.msrb.mxu0 %v400_v20  ;;  %458 = vmatpush.msrb.mxu1 %v416_v21  ;;  %v409_v40 = vld [vmem:[%s875_s3 + $0xc0] sm:$0xff]  ;;  %v392_v41 = vld [vmem:[%s875_s3 + $0x38] sm:$0xff]  ;;  %v391_v43 = vld [vmem:[%s875_s3 + $0x30] sm:$0xff] }
  0x19   : > { %609 = vmatpush.msra.mxu3 %v415_v23  ;;  %594 = vmatpush.msra.mxu2 %v398_v24  ;;  %v408_v42 = vld [vmem:[%s875_s3 + $0xb8] sm:$0xff]  ;;  %v407_v44 = vld [vmem:[%s875_s3 + $0xb0] sm:$0xff]  ;;  %v390_v45 = vld [vmem:[%s875_s3 + $0x28] sm:$0xff] }
  0x1a   : > { %418 = vmatpush.msrb.mxu0 %v399_v22  ;;  %459 = vmatpush.msrb.mxu1 %v415_v23  ;;  %v406_v46 = vld [vmem:[%s875_s3 + $0xa8] sm:$0xff]  ;;  %v389_v47 = vld [vmem:[%s875_s3 + $0x20] sm:$0xff]  ;;  %v388_v49 = vld [vmem:[%s875_s3 + $0x18] sm:$0xff] }
  0x1b   : > { %610 = vmatpush.msra.mxu3 %v414_v25  ;;  %254 = vperm.xlu2 %635, %v220_v28   ;;  %v405_v48 = vld [vmem:[%s875_s3 + $0xa0] sm:$0xff]  ;;  %v404_v50 = vld [vmem:[%s875_s3 + $0x98] sm:$0xff]  ;;  %v387_v51 = vld [vmem:[%s875_s3 + $0x10] sm:$0xff] }
  0x1c   : > { %419 = vmatpush.msrb.mxu0 %v398_v24  ;;  %460 = vmatpush.msrb.mxu1 %v414_v25  ;;  %v403_v52 = vld [vmem:[%s875_s3 + $0x90] sm:$0xff]  ;;  %v386_v53 = vld [vmem:[%s875_s3 + $0x8] sm:$0xff]  ;;  %v385_v55 = vld [vmem:[%s875_s3] sm:$0xff] }
  0x1d   : > { %224 = vperm.xlu1 %634, %v214_v14   ;;  %259 = vperm.xlu0 %633, %v221_v15   ;;  %v402_v54 = vld [vmem:[%s875_s3 + $0x88] sm:$0xff]  ;;  %v401_v56 = vld [vmem:[%s875_s3 + $0x80] sm:$0xff] }
  0x1e   : > { %420 = vmatpush.msrb.mxu0 %v397_v26  ;;  %461 = vmatpush.msrb.mxu1 %v413_v29 }
  0x1f   : > { %573 = vmatmul.msk.f32.gmra.mxu0 %vm262_vm0, %v199_v16  ;;  %581 = vmatmul.msk.f32.gmra.mxu1 %vm262_vm0, %v199_v16 }
  0x20   : > { %421 = vmatpush.msrb.mxu0 %v396_v30  ;;  %595 = vmatpush.msra.mxu2 %v397_v26 }
  0x21   : > { %462 = vmatpush.msrb.mxu1 %v412_v31  ;;  %611 = vmatpush.msra.mxu3 %v413_v29 }
  0x22   : > { %596 = vmatpush.msra.mxu2 %v396_v30  ;;  %422 = vmatpush.msrb.mxu0 %v395_v35 }
  0x23   : > { %612 = vmatpush.msra.mxu3 %v412_v31  ;;  %463 = vmatpush.msrb.mxu1 %v411_v36 }
  0x24   : > { %597 = vmatpush.msra.mxu2 %v395_v35  ;;  %423 = vmatpush.msrb.mxu0 %v394_v37 }
  0x25   : > { %613 = vmatpush.msra.mxu3 %v411_v36  ;;  %464 = vmatpush.msrb.mxu1 %v410_v38 }
  0x26   : > { %598 = vmatpush.msra.mxu2 %v394_v37  ;;  %424 = vmatpush.msrb.mxu0 %v393_v39 }
  0x27   : > { %574 = vmatmul.msk.f32.gmra.mxu0 %vm262_vm0, %v200_v17  ;;  %582 = vmatmul.msk.f32.gmra.mxu1 %vm262_vm0, %v200_v17 }
  0x28   : > { %614 = vmatpush.msra.mxu3 %v410_v38  ;;  %465 = vmatpush.msrb.mxu1 %v409_v40 }
  0x29   : > { %599 = vmatpush.msra.mxu2 %v393_v39  ;;  %425 = vmatpush.msrb.mxu0 %v392_v41 }
  0x2a   : > { %615 = vmatpush.msra.mxu3 %v409_v40  ;;  %466 = vmatpush.msrb.mxu1 %v408_v42 }
  0x2b   : > { %600 = vmatpush.msra.mxu2 %v392_v41  ;;  %426 = vmatpush.msrb.mxu0 %v391_v43 }
  0x2c   : > { %616 = vmatpush.msra.mxu3 %v408_v42  ;;  %467 = vmatpush.msrb.mxu1 %v407_v44 }
  0x2d   : > { %601 = vmatpush.msra.mxu2 %v391_v43  ;;  %427 = vmatpush.msrb.mxu0 %v390_v45 }
  0x2e   : > { %617 = vmatpush.msra.mxu3 %v407_v44  ;;  %468 = vmatpush.msrb.mxu1 %v406_v46 }
  0x2f   : > { %575 = vmatmul.msk.f32.gmra.mxu0 %vm262_vm0, %v201_v18  ;;  %583 = vmatmul.msk.f32.gmra.mxu1 %vm262_vm0, %v201_v18 }
  0x30   : > { %602 = vmatpush.msra.mxu2 %v390_v45  ;;  %618 = vmatpush.msra.mxu3 %v406_v46 }
  0x31   : > { %428 = vmatpush.msrb.mxu0 %v389_v47  ;;  %469 = vmatpush.msrb.mxu1 %v405_v48 }
  0x32   : > { %603 = vmatpush.msra.mxu2 %v389_v47  ;;  %619 = vmatpush.msra.mxu3 %v405_v48 }
  0x33   : > { %429 = vmatpush.msrb.mxu0 %v388_v49  ;;  %470 = vmatpush.msrb.mxu1 %v404_v50 }
  0x34   : > { %604 = vmatpush.msra.mxu2 %v388_v49  ;;  %620 = vmatpush.msra.mxu3 %v404_v50 }
  0x35   : > { %430 = vmatpush.msrb.mxu0 %v387_v51  ;;  %471 = vmatpush.msrb.mxu1 %v403_v52 }
  0x36   : > { %605 = vmatpush.msra.mxu2 %v387_v51  ;;  %621 = vmatpush.msra.mxu3 %v403_v52 }
  0x37   : > { %576 = vmatmul.msk.f32.gmra.mxu0 %vm262_vm0, %v202_v27  ;;  %584 = vmatmul.msk.f32.gmra.mxu1 %vm262_vm0, %v202_v27 }
  0x38   : > { %431 = vmatpush.msrb.mxu0 %v386_v53  ;;  %472 = vmatpush.msrb.mxu1 %v402_v54 }
  0x39   : > { %606 = vmatpush.msra.mxu2 %v386_v53  ;;  %622 = vmatpush.msra.mxu3 %v402_v54 }
  0x3a   : > { %432 = vmatpush.msrb.mxu0 %v385_v55  ;;  %473 = vmatpush.msrb.mxu1 %v401_v56 }
  0x3b   : > { %607 = vmatpush.msra.mxu2 %v385_v55  ;;  %623 = vmatpush.msra.mxu3 %v401_v56 }
  0x3f   : > { %577 = vmatmul.msk.f32.gmra.mxu0 %vm262_vm0, %v203_v32  ;;  %585 = vmatmul.msk.f32.gmra.mxu1 %vm262_vm0, %v203_v32 }
  0x47   : > { %578 = vmatmul.msk.f32.gmra.mxu0 %vm262_vm0, %v204_v33  ;;  %586 = vmatmul.msk.f32.gmra.mxu1 %vm262_vm0, %v204_v33 }
  0x4f   : > { %579 = vmatmul.msk.f32.gmra.mxu0 %vm262_vm0, %v205_v34  ;;  %587 = vmatmul.msk.f32.gmra.mxu1 %vm262_vm0, %v205_v34 }
  0x6c   : > { %v250_v28 = vpop.permute.xlu2 %249 }
  0x75   : > { %v255_v35 = vpop.permute.xlu2 %254 }
  0x7f   : > { %v240_v57 = vpop.permute.xlu1 %239  ;;  %v230_v2 = vpop.permute.xlu0 %229 }
  0x87   : > { %v245_v58 = vpop.permute.xlu1 %244  ;;  %v235_v9 = vpop.permute.xlu0 %234 }
  0x8f   : > { %v225_v59 = vpop.permute.xlu1 %224  ;;  %v260_v42 = vpop.permute.xlu0 %259 }
  0x94   : > { %v304_v60 = vpop.f32.mrf.mxu0  ;;  %v345_v61 = vpop.f32.mrf.mxu1 }
  0x95   : > { %v305_v62 = vadd.f32 %v304_v60, %v225_v59  ;;  %v346_v63 = vadd.f32 %v345_v61, %v225_v59 }
  0x97   : > { %v369_v0 = vmax.f32 %v305_v62, 0.0  ;;  %v370_v1 = vmax.f32 %v346_v63, 0.0 }
  0x99   : > { %433 = vmatmul.f32.vlgmr.msrb.gmra.mxu0 %v369_v0  ;;  %474 = vmatmul.f32.vlgmr.msrb.gmra.mxu1 %v370_v1 }
  0x9c   : > { %v307_v3 = vpop.f32.mrf.mxu0  ;;  %v348_v4 = vpop.f32.mrf.mxu1 }
  0x9d   : > { %v308_v5 = vadd.f32 %v307_v3, %v230_v2  ;;  %v349_v6 = vadd.f32 %v348_v4, %v230_v2 }
  0x9f   : > { %v371_v7 = vmax.f32 %v308_v5, 0.0  ;;  %v372_v8 = vmax.f32 %v349_v6, 0.0 }
  0xa1   : > { %436 = vmatmul.f32.vlgmr.msra.gmra.mxu2 %v371_v7  ;;  %477 = vmatmul.f32.vlgmr.msra.gmra.mxu3 %v372_v8 }
  0xa4   : > { %v310_v10 = vpop.f32.mrf.mxu0  ;;  %v351_v11 = vpop.f32.mrf.mxu1 }
  0xa5   : > { %v311_v12 = vadd.f32 %v310_v10, %v235_v9  ;;  %v352_v13 = vadd.f32 %v351_v11, %v235_v9 }
  0xa7   : > { %v373_v14 = vmax.f32 %v311_v12, 0.0  ;;  %v374_v15 = vmax.f32 %v352_v13, 0.0 }
  0xa9   : > { %439 = vmatmul.f32.gmra.mxu2 %v373_v14  ;;  %480 = vmatmul.f32.gmra.mxu3 %v374_v15 }
  0xac   : > { %v313_v16 = vpop.f32.mrf.mxu0  ;;  %v354_v17 = vpop.f32.mrf.mxu1 }
  0xad   : > { %v314_v18 = vadd.f32 %v313_v16, %v240_v57  ;;  %v355_v19 = vadd.f32 %v354_v17, %v240_v57 }
  0xaf   : > { %v375_v20 = vmax.f32 %v314_v18, 0.0  ;;  %v376_v21 = vmax.f32 %v355_v19, 0.0 }
  0xb1   : > { %442 = vmatmul.f32.gmra.mxu2 %v375_v20  ;;  %483 = vmatmul.f32.gmra.mxu3 %v376_v21 }
  0xb4   : > { %v316_v22 = vpop.f32.mrf.mxu0  ;;  %v357_v23 = vpop.f32.mrf.mxu1 }
  0xb5   : > { %v317_v24 = vadd.f32 %v316_v22, %v245_v58  ;;  %v358_v25 = vadd.f32 %v357_v23, %v245_v58 }
  0xb7   : > { %v377_v26 = vmax.f32 %v317_v24, 0.0  ;;  %v378_v27 = vmax.f32 %v358_v25, 0.0 }
  0xb9   : > { %445 = vmatmul.f32.gmra.mxu2 %v377_v26  ;;  %486 = vmatmul.f32.gmra.mxu3 %v378_v27 }
  0xbc   : > { %v319_v29 = vpop.f32.mrf.mxu0  ;;  %v360_v30 = vpop.f32.mrf.mxu1 }
  0xbd   : > { %v320_v31 = vadd.f32 %v319_v29, %v250_v28  ;;  %v361_v32 = vadd.f32 %v360_v30, %v250_v28 }
  0xbf   : > { %v379_v33 = vmax.f32 %v320_v31, 0.0  ;;  %v380_v34 = vmax.f32 %v361_v32, 0.0 }
  0xc1   : > { %448 = vmatmul.f32.gmra.mxu2 %v379_v33  ;;  %489 = vmatmul.f32.gmra.mxu3 %v380_v34 }
  0xc4   : > { %v322_v36 = vpop.f32.mrf.mxu0  ;;  %v363_v37 = vpop.f32.mrf.mxu1 }
  0xc5   : > { %v323_v38 = vadd.f32 %v322_v36, %v255_v35  ;;  %v364_v39 = vadd.f32 %v363_v37, %v255_v35 }
  0xc7   : > { %v381_v40 = vmax.f32 %v323_v38, 0.0  ;;  %v382_v41 = vmax.f32 %v364_v39, 0.0 }
  0xc9   : > { %451 = vmatmul.f32.gmra.mxu2 %v381_v40  ;;  %492 = vmatmul.f32.gmra.mxu3 %v382_v41 }
  0xcc   : > { %v325_v43 = vpop.f32.mrf.mxu0  ;;  %v366_v44 = vpop.f32.mrf.mxu1 }
  0xcd   : > { %v326_v45 = vadd.f32 %v325_v43, %v260_v42  ;;  %v367_v46 = vadd.f32 %v366_v44, %v260_v42 }
  0xcf   : > { %v383_v47 = vmax.f32 %v326_v45, 0.0  ;;  %v384_v48 = vmax.f32 %v367_v46, 0.0 }
  0xd1   : > { %454 = vmatmul.f32.gmra.mxu2 %v383_v47  ;;  %495 = vmatmul.f32.gmra.mxu3 %v384_v48 }
 0x116   : > { %v434_v49 = vpop.f32.mrf.mxu0  ;;  %v475_v50 = vpop.f32.mrf.mxu1 }
 0x117   : > { %v476_v51 = vadd.f32 %v475_v50, %v434_v49 }
 0x119   : > { %500 = vst.msk [vmem:[%s851_s27] sm:$0xff] %vm499_vm1, %v476_v51 }
 0x124   : > { %v437_v52 = vpop.f32.mrf.mxu2  ;;  %v478_v53 = vpop.f32.mrf.mxu3 }
 0x125   : > { %v479_v54 = vadd.f32 %v478_v53, %v437_v52 }
 0x127   : > { %501 = vst.msk [vmem:[%s851_s27 + $0x8] sm:$0xff] %vm499_vm1, %v479_v54 }
 0x12c   : > { %v440_v55 = vpop.f32.mrf.mxu2  ;;  %v481_v56 = vpop.f32.mrf.mxu3 }
 0x12d   : > { %v482_v57 = vadd.f32 %v481_v56, %v440_v55 }
 0x12f   : > { %502 = vst.msk [vmem:[%s851_s27 + $0x10] sm:$0xff] %vm499_vm1, %v482_v57 }
 0x134   : > { %v443_v58 = vpop.f32.mrf.mxu2  ;;  %v484_v59 = vpop.f32.mrf.mxu3 }
 0x135   : > { %v485_v60 = vadd.f32 %v484_v59, %v443_v58 }
 0x137   : > { %503 = vst.msk [vmem:[%s851_s27 + $0x18] sm:$0xff] %vm499_vm1, %v485_v60 }
 0x13c   : > { %v446_v61 = vpop.f32.mrf.mxu2  ;;  %v487_v62 = vpop.f32.mrf.mxu3 }
 0x13d   : > { %v488_v63 = vadd.f32 %v487_v62, %v446_v61 }
 0x13f   : > { %504 = vst.msk [vmem:[%s851_s27 + $0x20] sm:$0xff] %vm499_vm1, %v488_v63 }
 0x144   : > { %v449_v0 = vpop.f32.mrf.mxu2  ;;  %v490_v1 = vpop.f32.mrf.mxu3 }
 0x145   : > { %v491_v2 = vadd.f32 %v490_v1, %v449_v0 }
 0x147   : > { %505 = vst.msk [vmem:[%s851_s27 + $0x28] sm:$0xff] %vm499_vm1, %v491_v2 }
 0x14c   : > { %v452_v3 = vpop.f32.mrf.mxu2  ;;  %v493_v4 = vpop.f32.mrf.mxu3 }
 0x14d   : > { %v494_v5 = vadd.f32 %v493_v4, %v452_v3 }
 0x14f   : > { %506 = vst.msk [vmem:[%s851_s27 + $0x30] sm:$0xff] %vm499_vm1, %v494_v5 }
 0x154   : > { %v455_v6 = vpop.f32.mrf.mxu2  ;;  %v496_v7 = vpop.f32.mrf.mxu3 }
 0x155   : > { %v497_v8 = vadd.f32 %v496_v7, %v455_v6 }
 0x157   : > { %507 = vst.msk [vmem:[%s851_s27 + $0x38] sm:$0xff] %vm499_vm1, %v497_v8 }
 0x158 PF: > { %s14_s15 = sadd.s32 1, %s642_s15  }
 0x159   : > { %p11_p4 = scmp.ge.s32.totalorder %s14_s15, 4  }
 0x15b   :  { %13 = sbr.rel (!%p11_p4) target bundleno = 1 (0x1), region = 66 }

</bundles_post_ra>
